<compile_context>
chip_gen: v7x
topology: tpu7x:2x2x1
jax: 0.10.0
libtpu: 0.0.40
codegen_flags: <defaults>
</compile_context>

<pallas_src>
import functools
import math

import jax
import jax.numpy as jnp
from jax.experimental import pallas as pl
from jax.experimental.pallas import tpu as pltpu


def _elementwise_dtype():
    """bf16 post-matmul chain on chips with bf16 VPU/EUP (v6e/v7x); f32 on
    older generations (v5e and earlier have no bf16 VPU/EUP paths)."""
    try:
        kind = jax.devices()[0].device_kind.lower()
    except Exception:
        return jnp.bfloat16
    if any(v in kind for v in ("v2", "v3", "v4", "v5")):
        return jnp.float32
    return jnp.bfloat16


def _attend(acc, b_ref, v_ref, bias_ref, out_ref, ew_dtype):
    # acc: (Bt*S, A) f32 pre-activation (Wh h + Ws s), bias b not yet added.
    bt, s = out_ref.shape
    a = acc.shape[-1]
    # Add b in f32, then split the row axis into (batch, source_len) while the
    # data is still f32 (S % 8 == 0 -> layout-trivial split); the narrower
    # elementwise intermediates below never need a relayouting reshape.
    acc = (acc + b_ref[...]).reshape(bt, s, a)
    t = jnp.tanh(acc.astype(ew_dtype))              # EUP; bf16 on v6e/v7x
    p = t * v_ref[...]                              # (bt, s, a) ew_dtype
    e = jnp.sum(p, axis=-1, dtype=jnp.float32)      # f32 lane reduce -> (bt, s)
    e = e + bias_ref[...]                           # masked_fill_ as add
    # softmax over source_len (lane axis), f32.
    m = jnp.max(e, axis=-1, keepdims=True)
    ex = jnp.exp(e - m)
    denom = jnp.sum(ex, axis=-1, keepdims=True)
    out_ref[...] = ex * pl.reciprocal(denom, approx=True)


def _bahdanau_kernel_2dot(enc_ref, dec_ref, bias_ref, wh_ref, ws_ref, b_ref,
                          v_ref, out_ref, *, ew_dtype):
    # enc_ref: (Bt*S, He)  dec_ref: (Bt*S, Hd)  bias_ref/out_ref: (Bt, S)
    # wh_ref: (He, A) bf16  ws_ref: (Hd, A) bf16  b_ref: (1, A) f32
    # v_ref : (1, A) ew_dtype
    acc = jnp.dot(enc_ref[...].astype(jnp.bfloat16), wh_ref[...],
                  preferred_element_type=jnp.float32)
    acc = acc + jnp.dot(dec_ref[...].astype(jnp.bfloat16), ws_ref[...],
                        preferred_element_type=jnp.float32)
    _attend(acc, b_ref, v_ref, bias_ref, out_ref, ew_dtype)


def _bahdanau_kernel_fused(enc_ref, dec_ref, bias_ref, w_ref, b_ref, v_ref,
                           out_ref, *, ew_dtype):
    # Single (He+Hd, A) contraction; used only when He % 128 == 0 so the
    # in-kernel lane concat is tile-aligned.
    x = jnp.concatenate([enc_ref[...].astype(jnp.bfloat16),
                         dec_ref[...].astype(jnp.bfloat16)], axis=-1)
    acc = jnp.dot(x, w_ref[...], preferred_element_type=jnp.float32)
    _attend(acc, b_ref, v_ref, bias_ref, out_ref, ew_dtype)


def bahdanau_attention2(encoder_outputs, decoder_state, mask, params, *,
                        block_b=None):
    """Forward pass of BahdanauAttention2 (bias=True; coverage / weight_norm /
    pointer_end_bias off).  encoder_outputs [B,S,He], decoder_state [B,S,Hd],
    mask [B,S] bool (True = masked out, as in masked_fill_).
    Returns attention [B, S] f32.

    Note: fully-masked rows return a uniform 1/S row (the torch module would
    produce NaN from softmax over all -inf)."""
    B, S, He = encoder_outputs.shape
    Hd = decoder_state.shape[-1]
    A = params["Wh"].shape[1]
    ew_dtype = _elementwise_dtype()

    # Tiny parameter tensors: cast in the wrapper (negligible HBM traffic).
    wh = params["Wh"].astype(jnp.bfloat16)                  # (He, A)
    ws = params["Ws"].astype(jnp.bfloat16)                  # (Hd, A)
    b = params["b"].reshape(1, A).astype(jnp.float32)       # (1, A)
    v = params["v"].reshape(1, A).astype(ew_dtype)          # (1, A)

    # masked_fill_(mask, -inf) as an additive bias; -1e30 (finite) gives the
    # same softmax whenever >=1 position is unmasked and never produces NaN.
    bias = jnp.where(mask, jnp.float32(-1e30), jnp.float32(0.0))

    # The big activations are NOT cast / copied in the wrapper.  S is only
    # padded (one HBM copy) when it is not a sublane multiple, so the
    # in-kernel (Bt*S, A) -> (Bt, S, A) split stays layout-trivial.
    Sp = ((S + 7) // 8) * 8
    enc, dec = encoder_outputs, decoder_state
    if Sp != S:
        enc = jnp.pad(enc, ((0, 0), (0, Sp - S), (0, 0)))
        dec = jnp.pad(dec, ((0, 0), (0, Sp - S), (0, 0)))
        bias = jnp.pad(bias, ((0, 0), (0, Sp - S)), constant_values=-1e30)

    # Contiguous [B,S,H] -> [B*S,H] is a bitcast reshape (no HBM pass).
    # TODO(synk): if decoder_state is really one vector per batch row
    # broadcast along S, accept [B, Hd] and project it once per row instead of
    # streaming a [B*S, Hd] slab (saves a factor of S of decoder HBM reads).
    enc2d = enc.reshape(B * Sp, He)
    dec2d = dec.reshape(B * Sp, Hd)

    # ---- batch-tile selection --------------------------------------------
    # VMEM per batch row: double-buffered input streams, in-kernel bf16
    # copies, the f32 (Sp, A) accumulator plus ~2 elementwise intermediates,
    # and bias/out.  Budget ~20 MiB so the working set stays comfortably
    # inside v7x's 64 MiB physical VMEM (and the explicit scoped limit below).
    ew_b = jnp.dtype(ew_dtype).itemsize
    per_row = (2 * Sp * (He * enc2d.dtype.itemsize + Hd * dec2d.dtype.itemsize)
               + Sp * (He + Hd) * 2
               + Sp * A * (4 + 2 * ew_b)
               + 4 * Sp * 4)
    budget = 20 * 1024 * 1024
    max_bt = max(1, budget // per_row)

    if block_b is not None:
        Bt = max(1, min(B, int(block_b)))
    elif B <= 8:
        Bt = B                      # too small to split usefully
    else:
        # Aim for >=2 (ideally 4-8) grid steps so the DMA pipeline can hide
        # transfers and v7x's two TensorCores both get work, bounded by VMEM.
        target_steps = min(8, max(2, B // 8))
        bt = min(max_bt, pl.cdiv(B, target_steps))
        if bt < B and bt >= 8:
            bt = (bt // 8) * 8      # sublane-aligned batch tiles
        # TODO(synk): for very large S*A even bt=1 may not fit; that regime
        # needs S-tiling with an online softmax.
        Bt = max(1, min(B, bt))
    grid = pl.cdiv(B, Bt)           # partial last tile: OOB rows are dropped

    common_specs = [
        pl.BlockSpec((Bt * Sp, He), lambda i: (i, 0)),
        pl.BlockSpec((Bt * Sp, Hd), lambda i: (i, 0)),
        pl.BlockSpec((Bt, Sp), lambda i: (i, 0)),
    ]
    # Fuse the two matmuls into one (He+Hd, A) contraction when the in-kernel
    # lane concat is 128-aligned; otherwise keep two dots sharing one
    # accumulator.  TODO(synk): the constant-index weight operands could be
    # single-buffered (pipeline_mode=pl.Buffered(1)) to save a little VMEM.
    if He % 128 == 0:
        kernel = functools.partial(_bahdanau_kernel_fused, ew_dtype=ew_dtype)
        weights = (jnp.concatenate([wh, ws], axis=0), b, v)
        weight_specs = [pl.BlockSpec((He + Hd, A), lambda i: (0, 0)),
                        pl.BlockSpec((1, A), lambda i: (0, 0)),
                        pl.BlockSpec((1, A), lambda i: (0, 0))]
    else:
        kernel = functools.partial(_bahdanau_kernel_2dot, ew_dtype=ew_dtype)
        weights = (wh, ws, b, v)
        weight_specs = [pl.BlockSpec((He, A), lambda i: (0, 0)),
                        pl.BlockSpec((Hd, A), lambda i: (0, 0)),
                        pl.BlockSpec((1, A), lambda i: (0, 0)),
                        pl.BlockSpec((1, A), lambda i: (0, 0))]

    out = pl.pallas_call(
        kernel,
        out_shape=jax.ShapeDtypeStruct((B, Sp), jnp.float32),
        grid_spec=pltpu.PrefetchScalarGridSpec(
            num_scalar_prefetch=0,
            grid=(grid,),
            in_specs=common_specs + weight_specs,
            out_specs=pl.BlockSpec((Bt, Sp), lambda i: (i, 0)),
        ),
        compiler_params=pltpu.CompilerParams(
            dimension_semantics=("parallel",),
            vmem_limit_bytes=48 * 1024 * 1024),
    )(enc2d, dec2d, bias, *weights)
    return out if Sp == S else out[:, :S]


def _reference(encoder_outputs, decoder_state, mask, params):
    feat = (encoder_outputs @ params["Wh"] +
            decoder_state @ params["Ws"] +
            params["b"][None, :, :])                         # [B, S, A]
    feat = jnp.tanh(feat)
    e = jnp.sum(feat * params["v"][None, :, :], axis=-1)     # [B, S]
    e = jnp.where(mask, -jnp.inf, e)
    return jax.nn.softmax(e, axis=1)


if __name__ == "__main__":
    # small, deterministic shapes consistent with the module's forward
    B, S = 2, 8
    enc_hidden, dec_hidden, attention_size = 64, 32, 128

    key = jax.random.PRNGKey(0)
    k_enc, k_dec, k_mask, k_wh, k_ws, k_b, k_v = jax.random.split(key, 7)

    encoder_outputs = jax.random.normal(k_enc, (B, S, enc_hidden), jnp.float32)
    decoder_state = jax.random.normal(k_dec, (B, S, dec_hidden), jnp.float32)
    mask = jax.random.bernoulli(k_mask, 0.3, (B, S))
    mask = mask.at[:, 0].set(False)   # guarantee >=1 unmasked position per row

    # Deterministic synthetic parameters (same shapes as the nn.Module):
    #   Wh: Linear(enc_hidden -> attention_size, bias=False)
    #   Ws: Linear(dec_hidden -> attention_size, bias=False)
    #   b : Parameter(1, 1, attention_size)   (stored here as [1, A])
    #   v : Linear(attention_size -> 1, bias=False) (stored as row [1, A])
    params = {
        "Wh": jax.random.normal(k_wh, (enc_hidden, attention_size),
                                jnp.float32) / math.sqrt(enc_hidden),
        "Ws": jax.random.normal(k_ws, (dec_hidden, attention_size),
                                jnp.float32) / math.sqrt(dec_hidden),
        "b": jax.random.normal(k_b, (1, attention_size), jnp.float32),
        "v": jax.random.normal(k_v, (1, attention_size),
                               jnp.float32) / math.sqrt(attention_size),
    }

    attn = bahdanau_attention2(encoder_outputs, decoder_state, mask, params)
    attn = jax.block_until_ready(attn)

    ref = _reference(encoder_outputs, decoder_state, mask, params)
    assert attn.shape == (B, S)
    # bf16 MXU inputs (and bf16 tanh chain on v6e/v7x) -> bf16-level tolerance.
    assert jnp.allclose(attn, ref, atol=2e-2, rtol=2e-2), (attn, ref)
    # attention rows sum to ~1 (approx. reciprocal in the softmax divide).
    assert jnp.allclose(jnp.sum(attn, axis=1), jnp.ones((B,)), atol=1e-3)
    # masked positions receive (numerically) zero attention
    assert bool(jnp.all(jnp.where(mask, attn, 0.0) < 1e-6))

    print("KERNEL_OK")
</pallas_src>

<mosaic_0001>
module attributes {stable_mosaic.version = 11 : i64} {
  func.func @_bahdanau_kernel_2dot(%arg0: i32, %arg1: memref<16x64xf32, #tpu.memory_space<vmem>>, %arg2: memref<16x32xf32, #tpu.memory_space<vmem>>, %arg3: memref<2x8xf32, #tpu.memory_space<vmem>>, %arg4: memref<64x128xbf16, #tpu.memory_space<vmem>>, %arg5: memref<32x128xbf16, #tpu.memory_space<vmem>>, %arg6: memref<1x128xf32, #tpu.memory_space<vmem>>, %arg7: memref<1x128xbf16, #tpu.memory_space<vmem>>, %arg8: memref<2x8xf32, #tpu.memory_space<vmem>>) attributes {dimension_semantics = [#tpu.dimension_semantics<parallel>], iteration_bounds = array<i64: 1>, scalar_prefetch = 0 : i64, scratch_operands = 0 : i64, tpu.core_type = #tpu.core_type<tc>, window_params = [{transform_indices = @transform_0, window_bounds = array<i64: 16, 64>}, {transform_indices = @transform_1, window_bounds = array<i64: 16, 32>}, {transform_indices = @transform_2, window_bounds = array<i64: 2, 8>}, {pipeline_mode = #tpu.pipeline_mode<synchronous>, transform_indices = @transform_3, window_bounds = array<i64: 64, 128>}, {pipeline_mode = #tpu.pipeline_mode<synchronous>, transform_indices = @transform_4, window_bounds = array<i64: 32, 128>}, {pipeline_mode = #tpu.pipeline_mode<synchronous>, transform_indices = @transform_5, window_bounds = array<i64: 1, 128>}, {pipeline_mode = #tpu.pipeline_mode<synchronous>, transform_indices = @transform_6, window_bounds = array<i64: 1, 128>}, {transform_indices = @transform_7, window_bounds = array<i64: 2, 8>}]} {
    %c0 = arith.constant 0 : index
    %c0_0 = arith.constant 0 : index
    %0 = vector.load %arg1[%c0, %c0_0] : memref<16x64xf32, #tpu.memory_space<vmem>>, vector<16x64xf32>
    %1 = arith.truncf %0 : vector<16x64xf32> to vector<16x64xbf16>
    %c0_1 = arith.constant 0 : index
    %c0_2 = arith.constant 0 : index
    %2 = vector.load %arg4[%c0_1, %c0_2] : memref<64x128xbf16, #tpu.memory_space<vmem>>, vector<64x128xbf16>
    %cst = arith.constant dense<0.000000e+00> : vector<16x128xf32>
    %3 = tpu.matmul %1, %2, %cst {dimension_numbers = #tpu.dot_dimension_numbers<[1], [0], [0], [1], [0, 0, 1, 1], [], []>} : vector<16x64xbf16>, vector<64x128xbf16>, vector<16x128xf32> -> vector<16x128xf32>
    %c0_3 = arith.constant 0 : index
    %c0_4 = arith.constant 0 : index
    %4 = vector.load %arg2[%c0_3, %c0_4] : memref<16x32xf32, #tpu.memory_space<vmem>>, vector<16x32xf32>
    %5 = arith.truncf %4 : vector<16x32xf32> to vector<16x32xbf16>
    %c0_5 = arith.constant 0 : index
    %c0_6 = arith.constant 0 : index
    %6 = vector.load %arg5[%c0_5, %c0_6] : memref<32x128xbf16, #tpu.memory_space<vmem>>, vector<32x128xbf16>
    %cst_7 = arith.constant dense<0.000000e+00> : vector<16x128xf32>
    %7 = tpu.matmul %5, %6, %cst_7 {dimension_numbers = #tpu.dot_dimension_numbers<[1], [0], [0], [1], [0, 0, 1, 1], [], []>} : vector<16x32xbf16>, vector<32x128xbf16>, vector<16x128xf32> -> vector<16x128xf32>
    %8 = arith.addf %3, %7 : vector<16x128xf32>
    %c0_8 = arith.constant 0 : index
    %c0_9 = arith.constant 0 : index
    %9 = vector.load %arg6[%c0_8, %c0_9] : memref<1x128xf32, #tpu.memory_space<vmem>>, vector<1x128xf32>
    %10 = vector.broadcast %9 : vector<1x128xf32> to vector<16x128xf32>
    %11 = arith.addf %8, %10 : vector<16x128xf32>
    %12 = vector.shape_cast %11 : vector<16x128xf32> to vector<2x8x128xf32>
    %13 = arith.truncf %12 : vector<2x8x128xf32> to vector<2x8x128xbf16>
    %14 = math.tanh %13 : vector<2x8x128xbf16>
    %c0_10 = arith.constant 0 : index
    %c0_11 = arith.constant 0 : index
    %15 = vector.load %arg7[%c0_10, %c0_11] : memref<1x128xbf16, #tpu.memory_space<vmem>>, vector<1x128xbf16>
    %16 = vector.shape_cast %15 : vector<1x128xbf16> to vector<1x1x128xbf16>
    %17 = vector.broadcast %16 : vector<1x1x128xbf16> to vector<2x8x128xbf16>
    %18 = arith.mulf %14, %17 : vector<2x8x128xbf16>
    %19 = arith.extf %18 : vector<2x8x128xbf16> to vector<2x8x128xf32>
    %cst_12 = arith.constant dense<0.000000e+00> : vector<2x8xf32>
    %20 = vector.multi_reduction <add>, %19, %cst_12 [2] : vector<2x8x128xf32> to vector<2x8xf32>
    %c0_13 = arith.constant 0 : index
    %c0_14 = arith.constant 0 : index
    %21 = vector.load %arg3[%c0_13, %c0_14] : memref<2x8xf32, #tpu.memory_space<vmem>>, vector<2x8xf32>
    %22 = arith.addf %20, %21 : vector<2x8xf32>
    %cst_15 = arith.constant dense<0xFF800000> : vector<2xf32>
    %23 = vector.multi_reduction <maximumf>, %22, %cst_15 [1] : vector<2x8xf32> to vector<2xf32>
    %24 = vector.shape_cast %23 : vector<2xf32> to vector<2x1xf32>
    %25 = vector.broadcast %24 : vector<2x1xf32> to vector<2x8xf32>
    %26 = arith.subf %22, %25 : vector<2x8xf32>
    %27 = math.exp %26 : vector<2x8xf32>
    %cst_16 = arith.constant dense<0.000000e+00> : vector<2xf32>
    %28 = vector.multi_reduction <add>, %27, %cst_16 [1] : vector<2x8xf32> to vector<2xf32>
    %29 = vector.shape_cast %28 : vector<2xf32> to vector<2x1xf32>
    %30 = tpu.reciprocal %29 {approx = true} : vector<2x1xf32> -> vector<2x1xf32>
    %31 = vector.broadcast %30 : vector<2x1xf32> to vector<2x8xf32>
    %32 = arith.mulf %27, %31 : vector<2x8xf32>
    %c0_17 = arith.constant 0 : index
    %c0_18 = arith.constant 0 : index
    %33 = vector.load %arg8[%c0_17, %c0_18] : memref<2x8xf32, #tpu.memory_space<vmem>>, vector<2x8xf32>
    tpu.vector_store %arg8[%c0_17, %c0_18], %32 {strides = array<i32>} : memref<2x8xf32, #tpu.memory_space<vmem>>, vector<2x8xf32>,
    return
  }
  func.func @transform_0(%arg0: i32) -> (i32, i32) {
    %c0_i32 = arith.constant 0 : i32
    %c0_i32_0 = arith.constant 0 : i32
    return %arg0, %c0_i32 : i32, i32
  }
  func.func @transform_1(%arg0: i32) -> (i32, i32) {
    %c0_i32 = arith.constant 0 : i32
    %c0_i32_0 = arith.constant 0 : i32
    return %arg0, %c0_i32 : i32, i32
  }
  func.func @transform_2(%arg0: i32) -> (i32, i32) {
    %c0_i32 = arith.constant 0 : i32
    %c0_i32_0 = arith.constant 0 : i32
    return %arg0, %c0_i32 : i32, i32
  }
  func.func @transform_3(%arg0: i32) -> (i32, i32) {
    %c0_i32 = arith.constant 0 : i32
    %c0_i32_0 = arith.constant 0 : i32
    %c0_i32_1 = arith.constant 0 : i32
    return %c0_i32, %c0_i32_0 : i32, i32
  }
  func.func @transform_4(%arg0: i32) -> (i32, i32) {
    %c0_i32 = arith.constant 0 : i32
    %c0_i32_0 = arith.constant 0 : i32
    %c0_i32_1 = arith.constant 0 : i32
    return %c0_i32, %c0_i32_0 : i32, i32
  }
  func.func @transform_5(%arg0: i32) -> (i32, i32) {
    %c0_i32 = arith.constant 0 : i32
    %c0_i32_0 = arith.constant 0 : i32
    %c0_i32_1 = arith.constant 0 : i32
    return %c0_i32, %c0_i32_0 : i32, i32
  }
  func.func @transform_6(%arg0: i32) -> (i32, i32) {
    %c0_i32 = arith.constant 0 : i32
    %c0_i32_0 = arith.constant 0 : i32
    %c0_i32_1 = arith.constant 0 : i32
    return %c0_i32, %c0_i32_0 : i32, i32
  }
  func.func @transform_7(%arg0: i32) -> (i32, i32) {
    %c0_i32 = arith.constant 0 : i32
    %c0_i32_0 = arith.constant 0 : i32
    return %arg0, %c0_i32 : i32, i32
  }
}

</mosaic_0001>

<bundles_post_ra>
// kernel: tpu_custom_call.1
= control target key start
LH: loop header
LB: loop body
LE: loop exit
PB: predicated region body
PF: predicated region fallthrough
CT: control target
= control target key end

     0   :  { %12 = vsyncpa [#allocation3], 0  ;;  %s719_s0 = inlined_call_operand.hbm [shape: f32[16,64], index: 0, kind: input, shape index: {}]   ;;  %s720_s1 = inlined_call_operand.hbm [shape: f32[16,32], index: 1, kind: input, shape index: {}]   ;;  %s721_s2 = inlined_call_operand.vmem [shape: f32[2,8], index: 2, kind: input, shape index: {}]   ;;  %s722_s3 = inlined_call_operand.hbm [shape: bf16[64,128], index: 3, kind: input, shape index: {}]   ;;  %s723_s4 = inlined_call_operand.hbm [shape: bf16[32,128], index: 4, kind: input, shape index: {}]   ;;  %s724_s5 = inlined_call_operand.vmem [shape: f32[1,128], index: 5, kind: input, shape index: {}]   ;;  %s725_s6 = inlined_call_operand.vmem [shape: bf16[1,128], index: 6, kind: input, shape index: {}]   ;;  %s726_s7 = inlined_call_operand.hbm [shape: f32[2,8], index: 7, kind: output, shape index: {}]  }
   0x1   :  { %13 = vsyncpa [#allocation6], 0 }
   0x2   :  { %14 = vsyncpa [#allocation9], 0 }
   0x3   :  { %15 = vsyncpa [#allocation4], 0  ;;  %s574_s24 = smov [#allocation5]   ;;  %s575_s26 = smov [#allocation2]  }
   0x4   :  { %s33_s25 = sshll.u32 %s574_s24, 4  ;;  %s21_s27 = sshll.u32 %s575_s26, 4  ;;  %s34_s25 = int_to_ptr.vmem [resolvable:$true] %s33_s25  ;;  %s626_s27 = int_to_ptr.vmem [resolvable:$true] %s21_s27 }
   0x5   :  { %s456_s30 = scalar_lea.hbm %s720_s1, 256 }
   0x6   :  { %p457_p0 = scmp.ne.s32.totalorder %s720_s1, %s456_s30  ;;  %p460_p1 = scmp.lt.u32.totalorder %s456_s30, %s720_s1 }
   0x8   :  { %p462_p2 = pnand %p460_p1, %p457_p0 }
   0xa   :  { %465 = shalt.err (!%p462_p2)
}
   0xb   :  { %s466_s12 = scalar_lea.vmem %s34_s25, 256  ;;  %p471_p4 = scmp.lt.s32.totalorder %s34_s25, %s34_s25 }
   0xc   :  { %p467_p3 = scmp.ne.s32.totalorder %s34_s25, %s466_s12  ;;  %p472_p5 = scmp.lt.s32.totalorder %s466_s12, %s466_s12 }
   0xe   :  { %p473_p6 = por %p472_p5, %p471_p4 }
  0x10   :  { %p474_p7 = pnand %p473_p6, %p467_p3 }
  0x12   :  { %477 = shalt.err (!%p474_p7)
}
  0x13   :  { %s576_s13 = smov 128   ;;  %s577_s14 = smov 8  }
  0x14   :  { %39 = dma.hbm_to_vmem [thread:$0]  %s720_s1, 256, %s34_s25, [#allocation6], %s576_s13, %s576_s13, %s577_s14  }
  0x15   :  { %s478_s19 = scalar_lea.hbm %s719_s0, 256 }
  0x16   :  { %p479_p8 = scmp.ne.s32.totalorder %s719_s0, %s478_s19  ;;  %p482_p9 = scmp.lt.u32.totalorder %s478_s19, %s719_s0 }
  0x18   :  { %p484_p10 = pnand %p482_p9, %p479_p8 }
  0x1a   :  { %487 = shalt.err (!%p484_p10)
}
  0x1b   :  { %s488_s24 = scalar_lea.vmem %s626_s27, 256  ;;  %p493_p12 = scmp.lt.s32.totalorder %s626_s27, %s626_s27 }
  0x1c   :  { %p489_p11 = scmp.ne.s32.totalorder %s626_s27, %s488_s24  ;;  %p494_p13 = scmp.lt.s32.totalorder %s488_s24, %s488_s24 }
  0x1e   :  { %p495_p0 = por %p494_p13, %p493_p12 }
  0x20   :  { %p496_p1 = pnand %p495_p0, %p489_p11 }
  0x22   :  { %499 = shalt.err (!%p496_p1)
}
  0x23   :  { %27 = dma.hbm_to_vmem [thread:$0]  %s719_s0, 256, %s626_s27, [#allocation3], %s576_s13, %s576_s13, %s577_s14  }
  0x24   :  { %s578_s26 = smov [#allocation7]   ;;  %s500_s8 = scalar_lea.hbm %s722_s3, 512 }
  0x25   :  { %s47_s28 = sshll.u32 %s578_s26, 4  ;;  %p501_p2 = scmp.ne.s32.totalorder %s722_s3, %s500_s8  ;;  %s48_s28 = int_to_ptr.vmem [resolvable:$true] %s47_s28 }
  0x26   :  { %p504_p3 = scmp.lt.u32.totalorder %s500_s8, %s722_s3 }
  0x28   :  { %p506_p4 = pnand %p504_p3, %p501_p2 }
  0x2a   :  { %509 = shalt.err (!%p506_p4)
}
  0x2b   :  { %s510_s15 = scalar_lea.vmem %s48_s28, 512  ;;  %p515_p6 = scmp.lt.s32.totalorder %s48_s28, %s48_s28 }
  0x2c   :  { %p511_p5 = scmp.ne.s32.totalorder %s48_s28, %s510_s15  ;;  %p516_p7 = scmp.lt.s32.totalorder %s510_s15, %s510_s15 }
  0x2e   :  { %p517_p8 = por %p516_p7, %p515_p6 }
  0x30   :  { %p518_p9 = pnand %p517_p8, %p511_p5 }
  0x32   :  { %521 = shalt.err (!%p518_p9)
}
  0x33   :  { %s579_s0 = smov 64   ;;  %s580_s27 = smov 4  }
  0x34   :  { %53 = dma.hbm_to_vmem [thread:$0]  %s722_s3, 512, %s48_s28, [#allocation6], %s579_s0, %s579_s0, %s580_s27  }
  0x35   :  { %s581_s16 = smov [#allocation8]   ;;  %s522_s20 = scalar_lea.hbm %s723_s4, 256 }
  0x36   :  { %s59_s17 = sshll.u32 %s581_s16, 4  ;;  %p523_p10 = scmp.ne.s32.totalorder %s723_s4, %s522_s20  ;;  %s60_s17 = int_to_ptr.vmem [resolvable:$true] %s59_s17 }
  0x37   :  { %p526_p11 = scmp.lt.u32.totalorder %s522_s20, %s723_s4 }
  0x39   :  { %p528_p12 = pnand %p526_p11, %p523_p10 }
  0x3b   :  { %531 = shalt.err (!%p528_p12)
}
  0x3c   :  { %s532_s1 = scalar_lea.vmem %s60_s17, 256  ;;  %p537_p0 = scmp.lt.s32.totalorder %s60_s17, %s60_s17 }
  0x3d   :  { %p533_p13 = scmp.ne.s32.totalorder %s60_s17, %s532_s1  ;;  %p538_p1 = scmp.lt.s32.totalorder %s532_s1, %s532_s1 }
  0x3f   :  { %p539_p2 = por %p538_p1, %p537_p0 }
  0x41   :  { %p540_p3 = pnand %p539_p2, %p533_p13 }
  0x43   :  { %543 = shalt.err (!%p540_p3)
}
  0x44   :  { %65 = dma.hbm_to_vmem [thread:$0]  %s723_s4, 256, %s60_s17, [#allocation9], %s579_s0, %s579_s0, %s580_s27  }
  0x45   :  { %566 = dma.done.wait [#allocation3], 256  }
  0x46   :  { %567 = vsyncadd [#allocation3], 4294967040 }
  0x47   :  { %568 = dma.done.wait [#allocation6], 768  }
  0x48   :  { %569 = vsyncadd [#allocation6], 4294966528 }
  0x49   :  { %570 = dma.done.wait [#allocation9], 256  }
  0x4a   :  { %571 = vsyncadd [#allocation9], 4294967040  ;;  %v582_v0 = vmov 0.0   ;;  %vm583_vm0 = vmmov 0   ;;  %v440_v1 = vld [vmem:[#allocation7] sm:$0xff]   ;;  %v441_v2 = vld [vmem:[#allocation7 + $0x8] sm:$0xff]   ;;  %v244_v13 = vlaneseq }
  0x4b   :  { %414 = vmatprep.subr.bf16.mxu1 %v582_v0  ;;  %406 = vmatprep.subr.bf16.mxu0 %v582_v0  ;;  %v442_v3 = vld [vmem:[#allocation8] sm:$0xff]   ;;  %v444_v4 = vld [vmem:[#allocation8 + $0x8] sm:$0xff]   ;;  %v94_v5 = vld [vmem:[#allocation5] sm:$0xff]  ;;  %vm113_vm1 = vcmask 261120   ;;  %vm182_vm2 = vcmask 523264   ;;  %v584_v44 = vmov 0  }
  0x4c   :  { %410 = vmatprep.mubr.msk.bf16.mxu0 %vm583_vm0, %v582_v0  ;;  %422 = vmatprep.mubr.msk.bf16.mxu1 %vm583_vm0, %v582_v0  ;;  %v95_v6 = vld [vmem:[#allocation5 + $0x8] sm:$0xff]  ;;  %v443_v7 = vld [vmem:[#allocation7 + $0x10] sm:$0xff]   ;;  %v83_v10 = vld [vmem:[#allocation2] sm:$0xff]  ;;  %v245_v14 = vshrl.u32 %v244_v13, 7  ;;  %v285_v51 = vand.u32 127, %v244_v13  ;;  %vm294_vm3 = vcmask 1041409  }
  0x4d   :  { %415 = vmatpush3.bf16.msra.mxu1 %v440_v1  ;;  %407 = vmatpush3.bf16.msra.mxu0 %v442_v3  ;;  %v96_v8 = vpack.c.bf16 %v95_v6, %v94_v5  ;;  %v445_v9 = vld [vmem:[#allocation7 + $0x18] sm:$0xff]   ;;  %v84_v11 = vld [vmem:[#allocation2 + $0x8] sm:$0xff]  ;;  %v256_v16 = vld [vmem:[%s721_s2] sm:$0x3]  ;;  %vm297_vm4 = vcmask 58368  }
  0x4e   :  { %416 = vmatprep.subr.bf16.mxu1 %v582_v0  ;;  %408 = vmatprep.subr.bf16.mxu0 %v582_v0  ;;  %v85_v12 = vpack.c.bf16 %v84_v11, %v83_v10  ;;  %v681_v15 = vsub.s32 0, %v245_v14  ;;  %v686_v17 = vsub.s32 1, %v245_v14  ;;  %v397_v25 = vld [vmem:[%s724_s5] ss:$0 sm:$0xff]  ;;  %v288_v52 = vsub.s32 %v285_v51, %v245_v14  ;;  %s585_s5 = smov [#allocation10]  }
  0x4f   :  { %v240_v35 = vld [vmem:[%s725_s6] sm:$0x1]  ;;  %438 = vset.pattern.permute.xlu0 %v584_v44  ;;  %439 = vset.pattern.permute.xlu1 %v584_v44  ;;  %s378_s6 = sshll.u32 %s585_s5, 4  ;;  %s379_s6 = int_to_ptr.vmem [resolvable:$true] %s378_s6 }
  0x50   :  { %v261_v18 = vrot.slane %v256_v16, %v681_v15  ;;  %v268_v19 = vrot.slane %v256_v16, %v686_v17  ;;  %v242_v36 = vpack.i.b16 %v240_v35, %v240_v35  ;;  %s544_s8 = scalar_lea.vmem %s379_s6, 32  ;;  %p549_p5 = scmp.lt.s32.totalorder %s379_s6, %s379_s6 }
  0x51   :  { %417 = vmatpush3.bf16.msra.mxu1 %v441_v2  ;;  %409 = vmatpush3.bf16.msra.mxu0 %v444_v4  ;;  %p545_p4 = scmp.ne.s32.totalorder %s379_s6, %s544_s8  ;;  %p550_p6 = scmp.lt.s32.totalorder %s544_s8, %s544_s8 }
  0x52   :  { %418 = vmatprep.subr.bf16.mxu1 %v582_v0  ;;  %263 = vbcast.lane.b32.xlu1 %v261_v18, 256  ;;  %v247_v37 = vrot.slane %v242_v36, %v681_v15 }
  0x53   :  { %p551_p7 = por %p550_p6, %p549_p5 }
  0x54   :  { %411 = vmatmul.mubr.msk.bf16.vlgmr.msra.gmra.mrb[0].mxu0 %vm113_vm1, %v96_v8 }
  0x55   :  { %419 = vmatpush3.bf16.msra.mxu1 %v443_v7  ;;  %p552_p8 = pnand %p551_p7, %p545_p4 }
  0x56   :  { %420 = vmatprep.subr.bf16.mxu1 %v582_v0  ;;  %270 = vbcast.lane.b32.xlu1 %v268_v19, 256 }
  0x59   :  { %421 = vmatpush3.bf16.msra.mxu1 %v445_v9 }
  0x5c   :  { %423 = vmatmul.mubr.msk.bf16.vlgmr.msra.gmra.mrb[0].mxu1 %vm182_vm2, %v85_v12 }
  0xc4   :  { %v264_v45 = vpop.permute.xlu1 %263 }
  0xc8   :  { %v271_v48 = vpop.permute.xlu1 %270 }
 0x127   :  { %v151_v20 = vpop.f32.mrb[0].mxu0 }
 0x128   :  { %v412_v21 = vpop.f32.mrb[1].mxu0 }
 0x129   :  { %v154_v22 = vpop.f32.mrb[2].mxu0 }
 0x12a   :  { %v413_v23 = vpop.f32.mrb[3].mxu0 }
 0x12f   :  { %v220_v24 = vpop.f32.mrb[0].mxu1 }
 0x130   :  { %v221_v26 = vadd.f32 %v220_v24, %v151_v20  ;;  %v424_v27 = vpop.f32.mrb[1].mxu1 }
 0x131   :  { %v223_v28 = vpop.f32.mrb[2].mxu1 }
 0x132   :  { %v234_v29 = vadd.f32 %v397_v25, %v221_v26  ;;  %v224_v30 = vadd.f32 %v223_v28, %v154_v22  ;;  %v425_v31 = vpop.f32.mrb[3].mxu1 }
 0x134   :  { %v236_v32 = vpack.c.bf16 %v234_v29, %v234_v29  ;;  %v235_v33 = vadd.f32 %v397_v25, %v224_v30 }
 0x136   :  { %446 = vtanh.bf16 %v236_v32  ;;  %v237_v34 = vpack.c.bf16 %v235_v33, %v235_v33 }
 0x138   :  { %448 = vtanh.bf16 %v237_v34 }
 0x141   :  { %v447_v38 = vpop.eup %446 }
 0x142   :  { %v248_v39 = vmul.bf16 %v447_v38, %v247_v37 }
 0x143   :  { %v449_v40 = vpop.eup %448 }
 0x144   :  { %v250_v41 = vunpack.c.l.bf16 %v248_v39  ;;  %v249_v42 = vmul.bf16 %v449_v40, %v247_v37 }
 0x146   :  { %252 = vadd.xlane.f32.xlu0 %v250_v41  ;;  %v251_v43 = vunpack.c.l.bf16 %v249_v42 }
 0x14a   :  { %254 = vadd.xlane.f32.xlu0 %v251_v43 }
 0x1d3   :  { %v253_v46 = vpop.xlane.xlu0 %252 }
 0x1d4   :  { %v274_v47 = vadd.f32 %v264_v45, %v253_v46 }
 0x1d6   :  { %279 = vperm.xlu0 %438, %v274_v47  }
 0x1d7   :  { %v255_v49 = vpop.xlane.xlu0 %254 }
 0x1d8   :  { %v275_v50 = vadd.f32 %v271_v48, %v255_v49 }
 0x1da   :  { %282 = vperm.xlu1 %439, %v275_v50  }
 0x255   :  { %v280_v53 = vpop.permute.xlu0 %279 }
 0x256   :  { %v289_v55 = vrot.slane %v280_v53, %v288_v52 }
 0x259   :  { %v283_v54 = vpop.permute.xlu1 %282 }
 0x25a   :  { %v293_v56 = vrot.slane %v283_v54, %v288_v52 }
 0x25c   :  { %v295_v57 = vsel %vm294_vm3, %v293_v56, %v289_v55 }
 0x25d   :  { %v298_v58 = vsel %vm297_vm4, %v295_v57, -inf }
 0x25e   :  { %299 = vmax.xlane.f32.xlu1 %v298_v58 }
 0x2eb   :  { %v300_v59 = vpop.xlane.xlu1 %299 }
 0x2ec   :  { %v305_v60 = vrot.slane %v300_v59, %v681_v15  ;;  %v309_v61 = vrot.slane %v300_v59, %v686_v17 }
 0x2ee   :  { %v312_v62 = vsub.f32 %v274_v47, %v305_v60  ;;  %v313_v63 = vsub.f32 %v275_v50, %v309_v61 }
 0x2f0   :  { %v314_v0 = vmul.f32 1.442695, %v312_v62  ;;  %v316_v1 = vmul.f32 1.442695, %v313_v63 }
 0x2f2   :  { %450 = vpow2.f32 %v314_v0 }
 0x2f3   :  { %452 = vpow2.f32 %v316_v1 }
 0x2fc   :  { %v451_v2 = vpop.eup %450 }
 0x2fd   :  { %v453_v3 = vpop.eup %452  ;;  %321 = vperm.xlu1 %439, %v451_v2  }
 0x2fe   :  { %324 = vperm.xlu0 %438, %v453_v3  }
 0x37c   :  { %v322_v4 = vpop.permute.xlu1 %321 }
 0x37d   :  { %v325_v5 = vpop.permute.xlu0 %324  ;;  %v329_v6 = vrot.slane %v322_v4, %v288_v52 }
 0x37e   :  { %v333_v7 = vrot.slane %v325_v5, %v288_v52 }
 0x380   :  { %v334_v8 = vsel %vm294_vm3, %v333_v7, %v329_v6 }
 0x381   :  { %v336_v9 = vsel %vm297_vm4, %v334_v8, 0.0 }
 0x382   :  { %337 = vadd.xlane.f32.xlu0 %v336_v9 }
 0x40f   :  { %v338_v10 = vpop.xlane.xlu0 %337 }
 0x410   :  { %454 = vrcp.f32 %v338_v10 }
 0x41a   :  { %v455_v11 = vpop.eup %454 }
 0x41b   :  { %v344_v12 = vrot.slane %v455_v11, %v681_v15  ;;  %v348_v14 = vrot.slane %v455_v11, %v686_v17 }
 0x41d   :  { %v351_v13 = vmul.f32 %v451_v2, %v344_v12  ;;  %v352_v16 = vmul.f32 %v453_v3, %v348_v14 }
 0x41f   :  { %356 = vperm.xlu1 %439, %v351_v13  }
 0x423   :  { %359 = vperm.xlu1 %439, %v352_v16  }
 0x49e   :  { %v357_v18 = vpop.permute.xlu1 %356 }
 0x49f   :  { %v364_v20 = vrot.slane %v357_v18, %v288_v52 }
 0x4a2   :  { %v360_v19 = vpop.permute.xlu1 %359 }
 0x4a3   :  { %v368_v21 = vrot.slane %v360_v19, %v288_v52 }
 0x4a5   :  { %v369_v22 = vsel %vm294_vm3, %v368_v21, %v364_v20 }
 0x4a6   :  { %371 = vst.msk [vmem:[#allocation10] sm:$0x3] %vm297_vm4, %v369_v22 }
 0x4a7   :  { %555 = shalt.err (!%p552_p8)
}
 0x4a8   :  { %s556_s11 = scalar_lea.hbm %s726_s7, 32 }
 0x4a9   :  { %p557_p9 = scmp.ne.s32.totalorder %s726_s7, %s556_s11  ;;  %p560_p10 = scmp.lt.u32.totalorder %s556_s11, %s726_s7 }
 0x4ab   :  { %p562_p11 = pnand %p560_p10, %p557_p9 }
 0x4ad   :  { %565 = shalt.err (!%p562_p11)
}
 0x4ae   :  { %381 = dma.vmem_to_hbm [thread:$0]  %s379_s6, 32, %s726_s7, [#allocation4]  }
 0x4af   :  { %572 = dma.done.wait [#allocation4], 32  }
 0x4b0   :  { %573 = vsyncadd [#allocation4], 4294967264 }
 0x4b1   :  { %385 = vsyncpa [#allocation3], 1 }
 0x4b2   :  { %386 = vsyncpa [#allocation6], 1 }
 0x4b3   :  { %387 = vsyncpa [#allocation9], 1 }
 0x4b4   :  { %388 = vsyncpa [#allocation4], 1 }

</bundles_post_ra>
